<compile_context>
chip_gen: v7x
topology: tpu7x:2x2x1
jax: 0.10.0
libtpu: 0.0.40
codegen_flags: <defaults>
</compile_context>

<pallas_src>
import jax
import jax.numpy as jnp
from jax.experimental import pallas as pl
from jax.experimental.pallas import tpu as pltpu


def _round_up(x: int, m: int) -> int:
    return ((x + m - 1) // m) * m


def _vmem_capacity_bytes() -> int:
    try:
        return int(pltpu.get_tpu_info().vmem_capacity_bytes)
    except Exception:
        return 64 << 20  # conservative (v7x); v5e/v6e have 128 MiB


def _single_buffered_spec(block_shape, index_map):
    """BlockSpec for operands whose index_map is constant across the grid.

    Buffered(1) stops the pipeline from double-buffering resident weights
    (the block never changes, so a second copy in VMEM is pure waste).
    Falls back to a plain BlockSpec if the running JAX lacks pipeline_mode.
    """
    try:
        return pl.BlockSpec(block_shape, index_map, pipeline_mode=pl.Buffered(1))
    except (AttributeError, TypeError, ValueError):
        return pl.BlockSpec(block_shape, index_map)


# --------------- resident-weight kernel (weights fit in VMEM) ---------------
def _kernel_resident(x_ref, w1_ref, b1_ref, w2_ref, b2_ref, o_ref):
    # lin1: (tb, n_in) @ (n_in, n_mid) + b1, f32 accumulation on the MXU
    h = jnp.dot(x_ref[...], w1_ref[...], preferred_element_type=jnp.float32)
    h = jnp.maximum(h + b1_ref[...], 0.0)          # bias broadcast + ReLU on VPU
    # lin2: (tb, n_mid) @ (n_mid, n_out) + b2
    y = jnp.dot(h.astype(w2_ref.dtype), w2_ref[...],
                preferred_element_type=jnp.float32)
    o_ref[...] = (y + b2_ref[...]).astype(o_ref.dtype)


# --------------- n_mid-streaming kernel (large weights) ---------------------
def _kernel_stream(x_ref, w1_ref, b1_ref, w2_ref, b2_ref, o_ref, acc_ref):
    k = pl.program_id(1)

    @pl.when(k == 0)
    def _():
        acc_ref[...] = jnp.zeros_like(acc_ref)

    # Chunk of h over n_mid; ReLU per chunk is exact (elementwise over columns).
    h = jnp.dot(x_ref[...], w1_ref[...], preferred_element_type=jnp.float32)
    h = jnp.maximum(h + b1_ref[...], 0.0)
    acc_ref[...] += jnp.dot(h.astype(w2_ref.dtype), w2_ref[...],
                            preferred_element_type=jnp.float32)

    @pl.when(k == pl.num_programs(1) - 1)
    def _():
        o_ref[...] = (acc_ref[...] + b2_ref[...]).astype(o_ref.dtype)


def double_lin(x, w1, b1, w2, b2, *, tb=None, tk_mid=None,
               force_stream=False, cast_to_bf16=False):
    """Fused Linear -> ReLU -> Linear.

    x:  (B, n_in)
    w1: (n_mid, n_in)   PyTorch nn.Linear weight layout
    b1: (n_mid,)
    w2: (n_out, n_mid)
    b2: (n_out,)
    returns (B, n_out)
    """
    B, n_in = x.shape
    n_mid = w1.shape[0]
    n_out = w2.shape[0]
    assert w1.shape[1] == n_in and w2.shape[1] == n_mid

    out_dtype = x.dtype
    compute_dtype = jnp.bfloat16 if cast_to_bf16 else x.dtype
    itemsize = jnp.dtype(compute_dtype).itemsize

    # Lane-align feature dims (128). Zero padding is exact: padded n_mid
    # columns of h are 0 -> ReLU 0 -> contribute 0 via zero w2 rows; padded
    # n_out columns are sliced off below.
    n_in_p = _round_up(n_in, 128)
    n_mid_p = _round_up(n_mid, 128)
    n_out_p = _round_up(n_out, 128)

    vmem_cap = _vmem_capacity_bytes()
    vmem_budget = int(0.85 * vmem_cap)  # headroom for compiler scratch / sems

    # ---- batch tile: multi-step grid so x/out DMAs pipeline with compute and
    # the batch axis has something to split across v7x's two TensorCores. ----
    if tb is None:
        if B >= 4096 and vmem_cap >= (96 << 20):
            tb = 1024                       # v5e/v6e: 128 MiB VMEM allows it
        elif B >= 2048:
            tb = 512
        elif B >= 64:
            tb = min(512, max(8, _round_up(pl.cdiv(B, 4), 8)))  # >= 4 steps
        else:
            tb = _round_up(max(B, 1), 8)
    tb = max(8, _round_up(tb, 8))
    tb = min(tb, _round_up(B, 8))

    w_bytes = ((n_in_p * n_mid_p + n_mid_p * n_out_p) * itemsize
               + (n_mid_p + n_out_p) * 4)

    def resident_vmem(tb_):
        # weights single-buffered; x/out tiles double-buffered; f32 h tile.
        return (w_bytes
                + 2 * tb_ * (n_in_p + n_out_p) * itemsize
                + tb_ * n_mid_p * 4)

    def stream_vmem(tb_, tk_):
        # streamed weight/bias chunks double-buffered; x/out tiles
        # double-buffered; f32 accumulator + f32 h chunk.
        return (2 * (n_in_p * tk_ + tk_ * n_out_p) * itemsize
                + 2 * (tk_ + n_out_p) * 4
                + 2 * tb_ * (n_in_p + n_out_p) * itemsize
                + tb_ * n_out_p * 4 + tb_ * tk_ * 4)

    tb_floor = min(tb, 64)
    use_stream = force_stream or (resident_vmem(tb_floor) > vmem_budget)
    if not use_stream:
        # Weights fit resident; if the batch tiles push us over, shrink tb.
        while resident_vmem(tb) > vmem_budget and tb > tb_floor:
            tb = max(tb_floor, _round_up(tb // 2, 8))

    if use_stream:
        if tk_mid is None:
            tk_mid = 512
        tk_mid = max(128, min(_round_up(tk_mid, 128), n_mid_p))
        while n_mid_p % tk_mid != 0:
            tk_mid -= 128

        def _shrink_tk(tk_):
            tk_ -= 128
            while tk_ > 128 and n_mid_p % tk_ != 0:
                tk_ -= 128
            return max(tk_, 128)

        while stream_vmem(tb, tk_mid) > vmem_budget and tk_mid > 128:
            tk_mid = _shrink_tk(tk_mid)
        while stream_vmem(tb, tk_mid) > vmem_budget and tb > 64:
            tb = max(64, _round_up(tb // 2, 8))
        # TODO(synk): if a single (n_in_p, 128)/(128, n_out_p) weight chunk
        # still exceeds VMEM, also tile n_in / n_out with extra grid axes.

    # ---- pad / transpose parameters (batch is NOT padded: grid uses cdiv and
    # Pallas masks the ragged last block; matmul rows are independent). ----
    x_p = x if n_in_p == n_in else jnp.pad(x, ((0, 0), (0, n_in_p - n_in)))
    x_p = x_p.astype(compute_dtype)
    w1_t = jnp.pad(w1.T, ((0, n_in_p - n_in), (0, n_mid_p - n_mid))).astype(compute_dtype)
    w2_t = jnp.pad(w2.T, ((0, n_mid_p - n_mid), (0, n_out_p - n_out))).astype(compute_dtype)
    b1_p = jnp.pad(b1, (0, n_mid_p - n_mid)).reshape(1, n_mid_p)
    b2_p = jnp.pad(b2, (0, n_out_p - n_out)).reshape(1, n_out_p)

    nb = pl.cdiv(B, tb)

    flops = 2 * B * (n_in_p * n_mid_p + n_mid_p * n_out_p)
    bytes_accessed = int(
        itemsize * (B * n_in_p + n_in_p * n_mid_p + n_mid_p * n_out_p)
        + 4 * (n_mid_p + n_out_p)
        + jnp.dtype(out_dtype).itemsize * B * n_out_p)
    cost = pl.CostEstimate(flops=flops, transcendentals=0,
                           bytes_accessed=bytes_accessed)

    if use_stream:
        nk = n_mid_p // tk_mid
        grid = (nb, nk)
        in_specs = [
            pl.BlockSpec((tb, n_in_p), lambda i, k: (i, 0)),        # x tile
            pl.BlockSpec((n_in_p, tk_mid), lambda i, k: (0, k)),    # w1 chunk
            pl.BlockSpec((1, tk_mid), lambda i, k: (0, k)),         # b1 chunk
            pl.BlockSpec((tk_mid, n_out_p), lambda i, k: (k, 0)),   # w2 chunk
            _single_buffered_spec((1, n_out_p), lambda i, k: (0, 0)),
        ]
        out_specs = pl.BlockSpec((tb, n_out_p), lambda i, k: (i, 0))
        scratch = [pltpu.VMEM((tb, n_out_p), jnp.float32)]
        kernel = _kernel_stream
        dim_sem = ("parallel", "arbitrary")
        vmem_est = stream_vmem(tb, tk_mid)
    else:
        grid = (nb,)
        in_specs = [
            pl.BlockSpec((tb, n_in_p), lambda i: (i, 0)),                     # x (streamed)
            _single_buffered_spec((n_in_p, n_mid_p), lambda i: (0, 0)),       # w1 resident
            _single_buffered_spec((1, n_mid_p), lambda i: (0, 0)),            # b1
            _single_buffered_spec((n_mid_p, n_out_p), lambda i: (0, 0)),      # w2 resident
            _single_buffered_spec((1, n_out_p), lambda i: (0, 0)),            # b2
        ]
        out_specs = pl.BlockSpec((tb, n_out_p), lambda i: (i, 0))
        scratch = []
        kernel = _kernel_resident
        dim_sem = ("parallel",)
        vmem_est = resident_vmem(tb)

    # Generation-aware scoped-VMEM limit: always set, >= 32 MiB when physical
    # VMEM allows, capped at ~85% of physical (never the full size).
    vmem_limit = min(_round_up(int(vmem_est * 1.25), 1 << 20) + (2 << 20),
                     vmem_budget)
    vmem_limit = max(vmem_limit, min(32 << 20, vmem_budget))
    # TODO(synk): on v7x, consider pltpu.CORE_PARALLEL (or pl.core_map over a
    # tensorcore mesh) on the batch axis; plain "parallel" may not split the
    # grid across the two TensorCores.

    out_p = pl.pallas_call(
        kernel,
        out_shape=jax.ShapeDtypeStruct((B, n_out_p), out_dtype),
        grid_spec=pltpu.PrefetchScalarGridSpec(
            num_scalar_prefetch=0,
            grid=grid,
            in_specs=in_specs,
            out_specs=out_specs,
            scratch_shapes=scratch),
        compiler_params=pltpu.CompilerParams(
            dimension_semantics=dim_sem,
            vmem_limit_bytes=int(vmem_limit)),
        cost_estimate=cost,
    )(x_p, w1_t, b1_p, w2_t, b2_p)

    return out_p[:, :n_out]


if __name__ == "__main__":
    key = jax.random.PRNGKey(0)
    kx, kw1, kb1, kw2, kb2, kx2, kw3, kw4 = jax.random.split(key, 8)

    # --- small shapes consistent with DoubleLin(n_in, n_mid, n_out) ---------
    B, n_in, n_mid, n_out = 8, 32, 64, 16
    x = jax.random.normal(kx, (B, n_in), dtype=jnp.float32)
    # PyTorch nn.Linear parameter shapes: weight (out, in), bias (out,)
    w1 = jax.random.normal(kw1, (n_mid, n_in), dtype=jnp.float32) * 0.1
    b1 = jax.random.normal(kb1, (n_mid,), dtype=jnp.float32) * 0.1
    w2 = jax.random.normal(kw2, (n_out, n_mid), dtype=jnp.float32) * 0.1
    b2 = jax.random.normal(kb2, (n_out,), dtype=jnp.float32) * 0.1

    out = jax.block_until_ready(double_lin(x, w1, b1, w2, b2))
    ref = jnp.maximum(x @ w1.T + b1, 0.0) @ w2.T + b2
    assert out.shape == (B, n_out)
    assert jnp.allclose(out, ref, atol=2e-5, rtol=2e-5), \
        float(jnp.max(jnp.abs(out - ref)))

    # --- exercise the n_mid-streaming (reduction-axis) path + ragged batch ---
    B2, n_in2, n_mid2, n_out2 = 12, 32, 256, 16
    x2 = jax.random.normal(kx2, (B2, n_in2), dtype=jnp.float32)
    w3 = jax.random.normal(kw3, (n_mid2, n_in2), dtype=jnp.float32) * 0.1
    b3 = jax.random.normal(kb1, (n_mid2,), dtype=jnp.float32) * 0.1
    w4 = jax.random.normal(kw4, (n_out2, n_mid2), dtype=jnp.float32) * 0.1
    b4 = jax.random.normal(kb2, (n_out2,), dtype=jnp.float32) * 0.1

    out2 = jax.block_until_ready(
        double_lin(x2, w3, b3, w4, b4, force_stream=True, tk_mid=128))
    ref2 = jnp.maximum(x2 @ w3.T + b3, 0.0) @ w4.T + b4
    assert out2.shape == (B2, n_out2)
    assert jnp.allclose(out2, ref2, atol=2e-5, rtol=2e-5), \
        float(jnp.max(jnp.abs(out2 - ref2)))

    print("KERNEL_OK")
</pallas_src>

<mosaic_0001>
module attributes {stable_mosaic.version = 11 : i64} {
  func.func @_kernel_resident(%arg0: i32, %arg1: memref<8x128xf32, #tpu.memory_space<vmem>>, %arg2: memref<128x128xf32, #tpu.memory_space<vmem>>, %arg3: memref<1x128xf32, #tpu.memory_space<vmem>>, %arg4: memref<128x128xf32, #tpu.memory_space<vmem>>, %arg5: memref<1x128xf32, #tpu.memory_space<vmem>>, %arg6: memref<8x128xf32, #tpu.memory_space<vmem>>) attributes {dimension_semantics = [#tpu.dimension_semantics<parallel>], iteration_bounds = array<i64: 1>, scalar_prefetch = 0 : i64, scratch_operands = 0 : i64, tpu.core_type = #tpu.core_type<tc>, window_params = [{transform_indices = @transform_0, window_bounds = array<i64: 8, 128>}, {pipeline_mode = #tpu.pipeline_mode<synchronous>, transform_indices = @transform_1, window_bounds = array<i64: 128, 128>}, {pipeline_mode = #tpu.pipeline_mode<synchronous>, transform_indices = @transform_2, window_bounds = array<i64: 1, 128>}, {pipeline_mode = #tpu.pipeline_mode<synchronous>, transform_indices = @transform_3, window_bounds = array<i64: 128, 128>}, {pipeline_mode = #tpu.pipeline_mode<synchronous>, transform_indices = @transform_4, window_bounds = array<i64: 1, 128>}, {transform_indices = @transform_5, window_bounds = array<i64: 8, 128>}]} {
    %c0 = arith.constant 0 : index
    %c0_0 = arith.constant 0 : index
    %0 = vector.load %arg1[%c0, %c0_0] : memref<8x128xf32, #tpu.memory_space<vmem>>, vector<8x128xf32>
    %c0_1 = arith.constant 0 : index
    %c0_2 = arith.constant 0 : index
    %1 = vector.load %arg2[%c0_1, %c0_2] : memref<128x128xf32, #tpu.memory_space<vmem>>, vector<128x128xf32>
    %cst = arith.constant dense<0.000000e+00> : vector<8x128xf32>
    %2 = tpu.matmul %0, %1, %cst {dimension_numbers = #tpu.dot_dimension_numbers<[1], [0], [0], [1], [0, 0, 1, 1], [], []>} : vector<8x128xf32>, vector<128x128xf32>, vector<8x128xf32> -> vector<8x128xf32>
    %c0_3 = arith.constant 0 : index
    %c0_4 = arith.constant 0 : index
    %3 = vector.load %arg3[%c0_3, %c0_4] : memref<1x128xf32, #tpu.memory_space<vmem>>, vector<1x128xf32>
    %4 = vector.broadcast %3 : vector<1x128xf32> to vector<8x128xf32>
    %5 = arith.addf %2, %4 : vector<8x128xf32>
    %cst_5 = arith.constant 0.000000e+00 : f32
    %6 = vector.broadcast %cst_5 : f32 to vector<8x128xf32>
    %7 = arith.maximumf %5, %6 : vector<8x128xf32>
    %c0_6 = arith.constant 0 : index
    %c0_7 = arith.constant 0 : index
    %8 = vector.load %arg4[%c0_6, %c0_7] : memref<128x128xf32, #tpu.memory_space<vmem>>, vector<128x128xf32>
    %cst_8 = arith.constant dense<0.000000e+00> : vector<8x128xf32>
    %9 = tpu.matmul %7, %8, %cst_8 {dimension_numbers = #tpu.dot_dimension_numbers<[1], [0], [0], [1], [0, 0, 1, 1], [], []>} : vector<8x128xf32>, vector<128x128xf32>, vector<8x128xf32> -> vector<8x128xf32>
    %c0_9 = arith.constant 0 : index
    %c0_10 = arith.constant 0 : index
    %10 = vector.load %arg5[%c0_9, %c0_10] : memref<1x128xf32, #tpu.memory_space<vmem>>, vector<1x128xf32>
    %11 = vector.broadcast %10 : vector<1x128xf32> to vector<8x128xf32>
    %12 = arith.addf %9, %11 : vector<8x128xf32>
    %c0_11 = arith.constant 0 : index
    %c0_12 = arith.constant 0 : index
    %13 = vector.load %arg6[%c0_11, %c0_12] : memref<8x128xf32, #tpu.memory_space<vmem>>, vector<8x128xf32>
    tpu.vector_store %arg6[%c0_11, %c0_12], %12 {strides = array<i32>} : memref<8x128xf32, #tpu.memory_space<vmem>>, vector<8x128xf32>,
    return
  }
  func.func @transform_0(%arg0: i32) -> (i32, i32) {
    %c0_i32 = arith.constant 0 : i32
    %c0_i32_0 = arith.constant 0 : i32
    return %arg0, %c0_i32 : i32, i32
  }
  func.func @transform_1(%arg0: i32) -> (i32, i32) {
    %c0_i32 = arith.constant 0 : i32
    %c0_i32_0 = arith.constant 0 : i32
    %c0_i32_1 = arith.constant 0 : i32
    return %c0_i32, %c0_i32_0 : i32, i32
  }
  func.func @transform_2(%arg0: i32) -> (i32, i32) {
    %c0_i32 = arith.constant 0 : i32
    %c0_i32_0 = arith.constant 0 : i32
    %c0_i32_1 = arith.constant 0 : i32
    return %c0_i32, %c0_i32_0 : i32, i32
  }
  func.func @transform_3(%arg0: i32) -> (i32, i32) {
    %c0_i32 = arith.constant 0 : i32
    %c0_i32_0 = arith.constant 0 : i32
    %c0_i32_1 = arith.constant 0 : i32
    return %c0_i32, %c0_i32_0 : i32, i32
  }
  func.func @transform_4(%arg0: i32) -> (i32, i32) {
    %c0_i32 = arith.constant 0 : i32
    %c0_i32_0 = arith.constant 0 : i32
    %c0_i32_1 = arith.constant 0 : i32
    return %c0_i32, %c0_i32_0 : i32, i32
  }
  func.func @transform_5(%arg0: i32) -> (i32, i32) {
    %c0_i32 = arith.constant 0 : i32
    %c0_i32_0 = arith.constant 0 : i32
    return %arg0, %c0_i32 : i32, i32
  }
}

</mosaic_0001>

<bundles_post_ra>
// kernel: tpu_custom_call.1
= control target key start
LH: loop header
LB: loop body
LE: loop exit
PB: predicated region body
PF: predicated region fallthrough
CT: control target
= control target key end

     0   :  { %10 = vsyncpa [#allocation3], 0  ;;  %s637_s0 = inlined_call_operand.hbm [shape: f32[8,128], index: 0, kind: input, shape index: {}]   ;;  %s638_s1 = inlined_call_operand.hbm [shape: f32[128,128], index: 1, kind: input, shape index: {}]   ;;  %s639_s2 = inlined_call_operand.vmem [shape: f32[1,128], index: 2, kind: input, shape index: {}]   ;;  %s640_s3 = inlined_call_operand.hbm [shape: f32[128,128], index: 3, kind: input, shape index: {}]   ;;  %s641_s4 = inlined_call_operand.vmem [shape: f32[1,128], index: 4, kind: input, shape index: {}]   ;;  %s642_s5 = inlined_call_operand.hbm [shape: f32[8,128], index: 5, kind: output, shape index: {}]  }
   0x1   :  { %11 = vsyncpa [#allocation6], 0 }
   0x2   :  { %12 = vsyncpa [#allocation4], 0  ;;  %s522_s18 = smov [#allocation5]   ;;  %s428_s22 = scalar_lea.hbm %s638_s1, 2048 }
   0x3   :  { %s28_s19 = sshll.u32 %s522_s18, 4  ;;  %p429_p0 = scmp.ne.s32.totalorder %s638_s1, %s428_s22  ;;  %s29_s19 = int_to_ptr.vmem [resolvable:$true] %s28_s19 }
   0x4   :  { %p432_p1 = scmp.lt.u32.totalorder %s428_s22, %s638_s1 }
   0x6   :  { %p434_p2 = pnand %p432_p1, %p429_p0 }
   0x8   :  { %437 = shalt.err (!%p434_p2)
}
   0x9   :  { %s438_s27 = scalar_lea.vmem %s29_s19, 2048  ;;  %p443_p4 = scmp.lt.s32.totalorder %s29_s19, %s29_s19 }
   0xa   :  { %p439_p3 = scmp.ne.s32.totalorder %s29_s19, %s438_s27  ;;  %p444_p5 = scmp.lt.s32.totalorder %s438_s27, %s438_s27 }
   0xc   :  { %p445_p6 = por %p444_p5, %p443_p4 }
   0xe   :  { %p446_p7 = pnand %p445_p6, %p439_p3 }
  0x10   :  { %449 = shalt.err (!%p446_p7)
}
  0x11   :  { %s523_s28 = smov 128   ;;  %s524_s29 = smov 8  }
  0x12   :  { %34 = dma.hbm_to_vmem [thread:$0]  %s638_s1, 2048, %s29_s19, [#allocation6], %s523_s28, %s523_s28, %s524_s29  }
  0x13   :  { %s525_s7 = smov [#allocation2]   ;;  %s526_s9 = smov [#allocation7]  }
  0x14   :  { %s19_s8 = sshll.u32 %s525_s7, 4  ;;  %s42_s10 = sshll.u32 %s526_s9, 4  ;;  %s20_s8 = int_to_ptr.vmem [resolvable:$true] %s19_s8  ;;  %s43_s10 = int_to_ptr.vmem [resolvable:$true] %s42_s10 }
  0x15   :  { %s450_s13 = scalar_lea.hbm %s637_s0, 128 }
  0x16   :  { %p451_p8 = scmp.ne.s32.totalorder %s637_s0, %s450_s13  ;;  %p454_p9 = scmp.lt.u32.totalorder %s450_s13, %s637_s0 }
  0x18   :  { %p456_p10 = pnand %p454_p9, %p451_p8 }
  0x1a   :  { %459 = shalt.err (!%p456_p10)
}
  0x1b   :  { %s460_s1 = scalar_lea.vmem %s20_s8, 128  ;;  %p465_p12 = scmp.lt.s32.totalorder %s20_s8, %s20_s8 }
  0x1c   :  { %p461_p11 = scmp.ne.s32.totalorder %s20_s8, %s460_s1  ;;  %p466_p13 = scmp.lt.s32.totalorder %s460_s1, %s460_s1 }
  0x1e   :  { %p467_p0 = por %p466_p13, %p465_p12 }
  0x20   :  { %p468_p1 = pnand %p467_p0, %p461_p11 }
  0x22   :  { %471 = shalt.err (!%p468_p1)
}
  0x23   :  { %22 = dma.hbm_to_vmem [thread:$0]  %s637_s0, 128, %s20_s8, [#allocation3]  }
  0x24   :  { %s472_s22 = scalar_lea.hbm %s640_s3, 2048 }
  0x25   :  { %p473_p2 = scmp.ne.s32.totalorder %s640_s3, %s472_s22  ;;  %p476_p3 = scmp.lt.u32.totalorder %s472_s22, %s640_s3 }
  0x27   :  { %p478_p4 = pnand %p476_p3, %p473_p2 }
  0x29   :  { %481 = shalt.err (!%p478_p4)
}
  0x2a   :  { %s482_s27 = scalar_lea.vmem %s43_s10, 2048  ;;  %p487_p6 = scmp.lt.s32.totalorder %s43_s10, %s43_s10 }
  0x2b   :  { %p483_p5 = scmp.ne.s32.totalorder %s43_s10, %s482_s27  ;;  %p488_p7 = scmp.lt.s32.totalorder %s482_s27, %s482_s27 }
  0x2d   :  { %p489_p8 = por %p488_p7, %p487_p6 }
  0x2f   :  { %p490_p9 = pnand %p489_p8, %p483_p5 }
  0x31   :  { %493 = shalt.err (!%p490_p9)
}
  0x32   :  { %48 = dma.hbm_to_vmem [thread:$0]  %s640_s3, 2048, %s43_s10, [#allocation6], %s523_s28, %s523_s28, %s524_s29  }
  0x33   :  { %516 = dma.done.wait [#allocation3], 128  }
  0x34   :  { %517 = vsyncadd [#allocation3], 4294967168 }
  0x35   :  { %518 = dma.done.wait [#allocation6], 4096  }
  0x36   :  { %519 = vsyncadd [#allocation6], 4294963200  ;;  %v527_v0 = vmov 0.0|0.0   ;;  %vm528_vm0 = vmmov 0   ;;  %v529_v1 = vmov 0.0   ;;  %v61_v2 = vld [vmem:[#allocation5] sm:$0xff] }
  0x37   :  { %371 = vmatprep.subr.bf16.mxu0 %v527_v0  ;;  %333 = vmatprep.mubr.msk.f32.mxu0 %vm528_vm0, %v529_v1  ;;  %v62_v3 = vld [vmem:[#allocation5 + $0x8] sm:$0xff]  ;;  %v63_v4 = vld [vmem:[#allocation5 + $0x10] sm:$0xff]  ;;  %v64_v6 = vld [vmem:[#allocation5 + $0x18] sm:$0xff]  ;;  %s530_s7 = smov [#allocation8]  }
  0x38   :  { %395 = vmatprep.subr.bf16.mxu1 %v527_v0  ;;  %368 = vmatprep.mubr.msk.f32.mxu1 %vm528_vm0, %v529_v1  ;;  %v372_v5 = vpack.c.bf16 %v62_v3, %v61_v2  ;;  %v375_v7 = vpack.c.bf16 %v64_v6, %v63_v4  ;;  %v65_v8 = vld [vmem:[#allocation5 + $0x20] sm:$0xff]  ;;  %v66_v9 = vld [vmem:[#allocation5 + $0x28] sm:$0xff]  ;;  %v157_v12 = vld [vmem:[#allocation7 + $0x10] sm:$0xff]  ;;  %s255_s8 = sshll.u32 %s530_s7, 4  ;;  %s256_s8 = int_to_ptr.vmem [resolvable:$true] %s255_s8 }
  0x39   :  { %v155_v10 = vld [vmem:[#allocation7] sm:$0xff]  ;;  %v156_v11 = vld [vmem:[#allocation7 + $0x8] sm:$0xff]  ;;  %v158_v13 = vld [vmem:[#allocation7 + $0x18] sm:$0xff]  ;;  %v378_v14 = vpack.c.bf16 %v66_v9, %v65_v8  ;;  %s494_s9 = scalar_lea.vmem %s256_s8, 128  ;;  %p499_p11 = scmp.lt.s32.totalorder %s256_s8, %s256_s8 }
  0x3a   :  { %373 = vmatpush3.bf16.msra.mxu0 %v372_v5  ;;  %v396_v15 = vpack.c.bf16 %v156_v11, %v155_v10  ;;  %v67_v16 = vld [vmem:[#allocation5 + $0x30] sm:$0xff]  ;;  %v68_v17 = vld [vmem:[#allocation5 + $0x38] sm:$0xff]  ;;  %v399_v18 = vpack.c.bf16 %v158_v13, %v157_v12  ;;  %v159_v19 = vld [vmem:[#allocation7 + $0x20] sm:$0xff]  ;;  %p495_p10 = scmp.ne.s32.totalorder %s256_s8, %s494_s9  ;;  %p500_p12 = scmp.lt.s32.totalorder %s494_s9, %s494_s9 }
  0x3b   :  { %374 = vmatprep.subr.bf16.mxu0 %v527_v0  ;;  %v160_v20 = vld [vmem:[#allocation7 + $0x28] sm:$0xff]  ;;  %v381_v21 = vpack.c.bf16 %v68_v17, %v67_v16  ;;  %v69_v22 = vld [vmem:[#allocation5 + $0x40] sm:$0xff]  ;;  %v161_v25 = vld [vmem:[#allocation7 + $0x30] sm:$0xff] }
  0x3c   :  { %397 = vmatpush3.bf16.msra.mxu1 %v396_v15  ;;  %v70_v23 = vld [vmem:[#allocation5 + $0x48] sm:$0xff]  ;;  %v402_v24 = vpack.c.bf16 %v160_v20, %v159_v19  ;;  %v162_v26 = vld [vmem:[#allocation7 + $0x38] sm:$0xff]  ;;  %v71_v28 = vld [vmem:[#allocation5 + $0x50] sm:$0xff]  ;;  %p501_p13 = por %p500_p12, %p499_p11 }
  0x3d   :  { %398 = vmatprep.subr.bf16.mxu1 %v527_v0  ;;  %v384_v27 = vpack.c.bf16 %v70_v23, %v69_v22  ;;  %v72_v29 = vld [vmem:[#allocation5 + $0x58] sm:$0xff]  ;;  %v405_v30 = vpack.c.bf16 %v162_v26, %v161_v25  ;;  %v163_v31 = vld [vmem:[#allocation7 + $0x40] sm:$0xff]  ;;  %v164_v32 = vld [vmem:[#allocation7 + $0x48] sm:$0xff] }
  0x3e   :  { %376 = vmatpush3.bf16.msra.mxu0 %v375_v7  ;;  %v387_v33 = vpack.c.bf16 %v72_v29, %v71_v28  ;;  %v73_v34 = vld [vmem:[#allocation5 + $0x60] sm:$0xff]  ;;  %v74_v35 = vld [vmem:[#allocation5 + $0x68] sm:$0xff]  ;;  %v408_v36 = vpack.c.bf16 %v164_v32, %v163_v31  ;;  %v165_v37 = vld [vmem:[#allocation7 + $0x50] sm:$0xff]  ;;  %p502_p0 = pnand %p501_p13, %p495_p10 }
  0x3f   :  { %377 = vmatprep.subr.bf16.mxu0 %v527_v0  ;;  %v166_v38 = vld [vmem:[#allocation7 + $0x58] sm:$0xff]  ;;  %v390_v39 = vpack.c.bf16 %v74_v35, %v73_v34  ;;  %v75_v40 = vld [vmem:[#allocation5 + $0x70] sm:$0xff]  ;;  %v167_v43 = vld [vmem:[#allocation7 + $0x60] sm:$0xff] }
  0x40   :  { %400 = vmatpush3.bf16.msra.mxu1 %v399_v18  ;;  %v76_v41 = vld [vmem:[#allocation5 + $0x78] sm:$0xff]  ;;  %v411_v42 = vpack.c.bf16 %v166_v38, %v165_v37  ;;  %v168_v44 = vld [vmem:[#allocation7 + $0x68] sm:$0xff]  ;;  %v169_v48 = vld [vmem:[#allocation7 + $0x70] sm:$0xff] }
  0x41   :  { %401 = vmatprep.subr.bf16.mxu1 %v527_v0  ;;  %v393_v45 = vpack.c.bf16 %v76_v41, %v75_v40  ;;  %v414_v46 = vpack.c.bf16 %v168_v44, %v167_v43  ;;  %v60_v47 = vld [vmem:[#allocation2] sm:$0xff] }
  0x42   :  { %379 = vmatpush3.bf16.msra.mxu0 %v378_v14  ;;  %v170_v49 = vld [vmem:[#allocation7 + $0x78] sm:$0xff] }
  0x43   :  { %380 = vmatprep.subr.bf16.mxu0 %v527_v0  ;;  %v417_v50 = vpack.c.bf16 %v170_v49, %v169_v48  ;;  %v265_v51 = vld [vmem:[%s639_s2] ss:$0 sm:$0xff] }
  0x44   :  { %403 = vmatpush3.bf16.msra.mxu1 %v402_v24  ;;  %v266_v56 = vld [vmem:[%s641_s4] ss:$0 sm:$0xff] }
  0x45   :  { %404 = vmatprep.subr.bf16.mxu1 %v527_v0 }
  0x46   :  { %382 = vmatpush3.bf16.msra.mxu0 %v381_v21 }
  0x47   :  { %383 = vmatprep.subr.bf16.mxu0 %v527_v0 }
  0x48   :  { %406 = vmatpush3.bf16.msra.mxu1 %v405_v30 }
  0x49   :  { %407 = vmatprep.subr.bf16.mxu1 %v527_v0 }
  0x4a   :  { %385 = vmatpush3.bf16.msra.mxu0 %v384_v27 }
  0x4b   :  { %386 = vmatprep.subr.bf16.mxu0 %v527_v0 }
  0x4c   :  { %409 = vmatpush3.bf16.msra.mxu1 %v408_v36 }
  0x4d   :  { %410 = vmatprep.subr.bf16.mxu1 %v527_v0 }
  0x4e   :  { %388 = vmatpush3.bf16.msra.mxu0 %v387_v33 }
  0x4f   :  { %389 = vmatprep.subr.bf16.mxu0 %v527_v0 }
  0x50   :  { %412 = vmatpush3.bf16.msra.mxu1 %v411_v42 }
  0x51   :  { %413 = vmatprep.subr.bf16.mxu1 %v527_v0 }
  0x52   :  { %391 = vmatpush3.bf16.msra.mxu0 %v390_v39 }
  0x53   :  { %392 = vmatprep.subr.bf16.mxu0 %v527_v0 }
  0x54   :  { %415 = vmatpush3.bf16.msra.mxu1 %v414_v46 }
  0x55   :  { %416 = vmatprep.subr.bf16.mxu1 %v527_v0 }
  0x56   :  { %394 = vmatpush3.bf16.msra.mxu0 %v393_v45 }
  0x58   :  { %418 = vmatpush3.bf16.msra.mxu1 %v417_v50 }
  0x59   :  { %334 = vmatmul.mubr.f32.vlgmr.msra.gmra.mrb[0].mxu0 %v60_v47 }
 0x12c   :  { %v150_v52 = vpop.f32.mrb[0].mxu0 }
 0x12d   :  { %v151_v53 = vadd.f32 %v265_v51, %v150_v52  ;;  %v335_v54 = vpop.f32.mrb[1].mxu0 }
 0x12f   :  { %v154_v55 = vmax.f32 %v151_v53, 0.0 }
 0x131   :  { %369 = vmatmul.mubr.f32.vlgmr.msra.gmra.mrb[0].mxu1 %v154_v55 }
 0x204   :  { %v244_v57 = vpop.f32.mrb[0].mxu1 }
 0x205   :  { %v245_v58 = vadd.f32 %v266_v56, %v244_v57  ;;  %v370_v59 = vpop.f32.mrb[1].mxu1 }
 0x207   :  { %248 = vst [vmem:[#allocation8] sm:$0xff] %v245_v58 }
 0x208   :  { %505 = shalt.err (!%p502_p0)
}
 0x209   :  { %s506_s11 = scalar_lea.hbm %s642_s5, 128 }
 0x20a   :  { %p507_p1 = scmp.ne.s32.totalorder %s642_s5, %s506_s11  ;;  %p510_p2 = scmp.lt.u32.totalorder %s506_s11, %s642_s5 }
 0x20c   :  { %p512_p3 = pnand %p510_p2, %p507_p1 }
 0x20e   :  { %515 = shalt.err (!%p512_p3)
}
 0x20f   :  { %258 = dma.vmem_to_hbm [thread:$0]  %s256_s8, 128, %s642_s5, [#allocation4]  }
 0x210   :  { %520 = dma.done.wait [#allocation4], 128  }
 0x211   :  { %521 = vsyncadd [#allocation4], 4294967168 }
 0x212   :  { %262 = vsyncpa [#allocation3], 1 }
 0x213   :  { %263 = vsyncpa [#allocation6], 1 }
 0x214   :  { %264 = vsyncpa [#allocation4], 1 }

</bundles_post_ra>
